<compile_context>
chip_gen: v7x
topology: tpu7x:2x2x1
jax: 0.10.0
libtpu: 0.0.40
codegen_flags: <defaults>
</compile_context>

<pallas_src>
import jax
import jax.numpy as jnp
from jax.experimental import pallas as pl
from jax.experimental.pallas import tpu as pltpu


def _norm_kernel(scale_ref, bias_ref, x_ref, o_ref):
    # scale_ref / bias_ref: VMEM (R, 1) f32 per-row affine params
    # x_ref / o_ref:        VMEM (R, L) tile of the flattened (N*C, H*W) data
    x = x_ref[...].astype(jnp.float32)
    o_ref[...] = (x * scale_ref[...] + bias_ref[...]).astype(o_ref.dtype)


def _pick_tiles(rows, cols, itemsize, target_block_bytes=2 << 20):
    """Pick a (R, L) tile: L a large multiple of 128 dividing cols (or full
    cols), R a multiple of 8 dividing rows (or full rows), ~target bytes."""
    # Lane (last-dim) tile.
    if cols % 128 == 0:
        cap = max(128, min(cols, 8192))
        L = 128
        d = 128
        while d <= cap:
            if cols % d == 0:
                L = d
            d += 128
    else:
        # Not 128-aligned: must take the full extent to satisfy block rules.
        L = cols
    # Row (sublane) tile, sized so double-buffered in+out stays small
    # (4 * target_block_bytes total -> safe even on v5e's 16 MiB scoped VMEM).
    max_rows = max(1, target_block_bytes // (L * itemsize))
    if rows % 8 == 0:
        R = min(rows, max(8, (max_rows // 8) * 8))
        while rows % R != 0:
            R -= 8
    else:
        R = rows
    return R, L


def mean_std_normalize(x, mean, std):
    """x: (N, C, H, W); mean, std: (C,).
    Returns (x - mean[:, None, None]) / std[:, None, None], dtype of x."""
    N, C, H, W = x.shape
    rows, cols = N * C, H * W

    # Precompute the per-channel affine in f32 (keeps precision even for bf16 x).
    mean_f32 = jnp.asarray(mean, jnp.float32)
    std_f32 = jnp.asarray(std, jnp.float32)
    scale = 1.0 / std_f32                      # (C,)
    bias = -mean_f32 / std_f32                 # (C,)

    # One scalar pair per row of the flattened (N*C, H*W) view; row = n*C + c.
    scale_rows = jnp.tile(scale, N).reshape(rows, 1)
    bias_rows = jnp.tile(bias, N).reshape(rows, 1)

    x2 = x.reshape(rows, cols)
    R, L = _pick_tiles(rows, cols, x.dtype.itemsize)
    grid = (rows // R, cols // L)

    out2 = pl.pallas_call(
        _norm_kernel,
        out_shape=jax.ShapeDtypeStruct((rows, cols), x.dtype),
        grid_spec=pltpu.PrefetchScalarGridSpec(
            num_scalar_prefetch=0,
            grid=grid,
            in_specs=[
                pl.BlockSpec((R, 1), lambda i, j: (i, 0)),   # scale rows
                pl.BlockSpec((R, 1), lambda i, j: (i, 0)),   # bias rows
                pl.BlockSpec((R, L), lambda i, j: (i, j)),   # data tile
            ],
            out_specs=pl.BlockSpec((R, L), lambda i, j: (i, j)),
        ),
        compiler_params=pltpu.CompilerParams(
            dimension_semantics=("parallel", "parallel"),
        ),
    )(scale_rows, bias_rows, x2)

    return out2.reshape(N, C, H, W)


def _reference(x, mean, std):
    return (x - mean[None, :, None, None]) / std[None, :, None, None]


if __name__ == "__main__":
    key = jax.random.PRNGKey(0)

    # Primary small test: batch=2, channels=4, spatial=16x16.
    N, C, H, W = 2, 4, 16, 16
    k1, k2 = jax.random.split(key)
    x = jax.random.normal(k1, (N, C, H, W), dtype=jnp.float32)
    mean = jnp.array([0.485, 0.456, 0.406, 0.400], dtype=jnp.float32)
    std = jnp.array([0.229, 0.224, 0.225, 0.230], dtype=jnp.float32)

    out = jax.block_until_ready(mean_std_normalize(x, mean, std))
    ref = _reference(x, mean, std)
    assert out.shape == x.shape and out.dtype == x.dtype
    assert jnp.allclose(out, ref, rtol=1e-5, atol=1e-6)

    # Secondary test exercising a multi-tile grid (lane dim split into tiles).
    N2, C2, H2, W2 = 2, 3, 96, 128
    x2 = jax.random.normal(k2, (N2, C2, H2, W2), dtype=jnp.float32)
    mean2 = jnp.array([0.485, 0.456, 0.406], dtype=jnp.float32)
    std2 = jnp.array([0.229, 0.224, 0.225], dtype=jnp.float32)

    out2 = jax.block_until_ready(mean_std_normalize(x2, mean2, std2))
    ref2 = _reference(x2, mean2, std2)
    assert jnp.allclose(out2, ref2, rtol=1e-5, atol=1e-6)

    print("KERNEL_OK")
</pallas_src>

<mosaic_0001>
module attributes {stable_mosaic.version = 11 : i64} {
  func.func @_norm_kernel(%arg0: i32, %arg1: i32, %arg2: memref<8x1xf32, #tpu.memory_space<vmem>>, %arg3: memref<8x1xf32, #tpu.memory_space<vmem>>, %arg4: memref<8x256xf32, #tpu.memory_space<vmem>>, %arg5: memref<8x256xf32, #tpu.memory_space<vmem>>) attributes {dimension_semantics = [#tpu.dimension_semantics<parallel>, #tpu.dimension_semantics<parallel>], iteration_bounds = array<i64: 1, 1>, scalar_prefetch = 0 : i64, scratch_operands = 0 : i64, tpu.core_type = #tpu.core_type<tc>, window_params = [{transform_indices = @transform_0, window_bounds = array<i64: 8, 1>}, {transform_indices = @transform_1, window_bounds = array<i64: 8, 1>}, {transform_indices = @transform_2, window_bounds = array<i64: 8, 256>}, {transform_indices = @transform_3, window_bounds = array<i64: 8, 256>}]} {
    %c0 = arith.constant 0 : index
    %c0_0 = arith.constant 0 : index
    %0 = vector.load %arg4[%c0, %c0_0] : memref<8x256xf32, #tpu.memory_space<vmem>>, vector<8x256xf32>
    %c0_1 = arith.constant 0 : index
    %c0_2 = arith.constant 0 : index
    %1 = vector.load %arg2[%c0_1, %c0_2] : memref<8x1xf32, #tpu.memory_space<vmem>>, vector<8x1xf32>
    %2 = vector.broadcast %1 : vector<8x1xf32> to vector<8x256xf32>
    %3 = arith.mulf %0, %2 : vector<8x256xf32>
    %c0_3 = arith.constant 0 : index
    %c0_4 = arith.constant 0 : index
    %4 = vector.load %arg3[%c0_3, %c0_4] : memref<8x1xf32, #tpu.memory_space<vmem>>, vector<8x1xf32>
    %5 = vector.broadcast %4 : vector<8x1xf32> to vector<8x256xf32>
    %6 = arith.addf %3, %5 : vector<8x256xf32>
    %c0_5 = arith.constant 0 : index
    %c0_6 = arith.constant 0 : index
    %7 = vector.load %arg5[%c0_5, %c0_6] : memref<8x256xf32, #tpu.memory_space<vmem>>, vector<8x256xf32>
    tpu.vector_store %arg5[%c0_5, %c0_6], %6 {strides = array<i32>} : memref<8x256xf32, #tpu.memory_space<vmem>>, vector<8x256xf32>,
    return
  }
  func.func @transform_0(%arg0: i32, %arg1: i32) -> (i32, i32) {
    %c0_i32 = arith.constant 0 : i32
    %c0_i32_0 = arith.constant 0 : i32
    return %arg0, %c0_i32 : i32, i32
  }
  func.func @transform_1(%arg0: i32, %arg1: i32) -> (i32, i32) {
    %c0_i32 = arith.constant 0 : i32
    %c0_i32_0 = arith.constant 0 : i32
    return %arg0, %c0_i32 : i32, i32
  }
  func.func @transform_2(%arg0: i32, %arg1: i32) -> (i32, i32) {
    %c0_i32 = arith.constant 0 : i32
    return %arg0, %arg1 : i32, i32
  }
  func.func @transform_3(%arg0: i32, %arg1: i32) -> (i32, i32) {
    %c0_i32 = arith.constant 0 : i32
    return %arg0, %arg1 : i32, i32
  }
}

</mosaic_0001>

<bundles_post_ra>
// kernel: tpu_custom_call.1
= control target key start
LH: loop header
LB: loop body
LE: loop exit
PB: predicated region body
PF: predicated region fallthrough
CT: control target
= control target key end

     0   :  { %s122_s0 = inlined_call_operand.vmem [shape: f32[8,1], index: 0, kind: input, shape index: {}]   ;;  %s123_s1 = inlined_call_operand.vmem [shape: f32[8,1], index: 1, kind: input, shape index: {}]   ;;  %s124_s2 = inlined_call_operand.vmem [shape: f32[8,256], index: 2, kind: input, shape index: {}]   ;;  %s125_s3 = inlined_call_operand.hbm [shape: f32[8,256], index: 3, kind: output, shape index: {}]  }
   0x1   :  { %v17_v0 = vld [vmem:[%s122_s0] sm:$0xff] }
   0x2   :  { %8 = vsyncpa [#allocation3], 0  ;;  %v76_v1 = vmov 0   ;;  %v25_v2 = vld [vmem:[%s123_s1] sm:$0xff]  ;;  %v16_v5 = vld [vmem:[%s124_s2 + $0x8] sm:$0xff]  ;;  %s77_s20 = smov [#allocation2]  }
   0x3   :  { %51 = vset.pattern.permute.xlu0 %v76_v1  ;;  %v15_v4 = vld [vmem:[%s124_s2] sm:$0xff]  ;;  %s41_s0 = sshll.u32 %s77_s20, 4  ;;  %s42_s0 = int_to_ptr.vmem [resolvable:$true] %s41_s0 }
   0x4   :  { %20 = vperm.xlu0 %51, %v17_v0   ;;  %s52_s1 = scalar_lea.vmem %s42_s0, 256  ;;  %p57_p1 = scmp.lt.s32.totalorder %s42_s0, %s42_s0 }
   0x5   :  { %p53_p0 = scmp.ne.s32.totalorder %s42_s0, %s52_s1  ;;  %p58_p2 = scmp.lt.s32.totalorder %s52_s1, %s52_s1 }
   0x7   :  { %p59_p3 = por %p58_p2, %p57_p1 }
   0x8   :  { %28 = vperm.xlu0 %51, %v25_v2  }
   0x9   :  { %p60_p4 = pnand %p59_p3, %p53_p0 }
  0x83   :  { %v21_v3 = vpop.permute.xlu0 %20 }
  0x84   :  { %v23_v6 = vmul.f32 %v21_v3, %v15_v4  ;;  %v24_v7 = vmul.f32 %v21_v3, %v16_v5 }
  0x87   :  { %v29_v8 = vpop.permute.xlu0 %28 }
  0x88   :  { %v31_v9 = vadd.f32 %v29_v8, %v23_v6  ;;  %v32_v10 = vadd.f32 %v29_v8, %v24_v7 }
  0x8a   :  { %33 = vst [vmem:[#allocation2] sm:$0xff] %v31_v9  ;;  %34 = vst [vmem:[#allocation2 + $0x8] sm:$0xff] %v32_v10 }
  0x8b   :  { %63 = shalt.err (!%p60_p4)
}
  0x8c   :  { %s64_s2 = scalar_lea.hbm %s125_s3, 256 }
  0x8d   :  { %p65_p5 = scmp.ne.s32.totalorder %s125_s3, %s64_s2  ;;  %p68_p6 = scmp.lt.u32.totalorder %s64_s2, %s125_s3 }
  0x8f   :  { %p70_p7 = pnand %p68_p6, %p65_p5 }
  0x91   :  { %73 = shalt.err (!%p70_p7)
}
  0x92   :  { %44 = dma.vmem_to_hbm [thread:$0]  %s42_s0, 256, %s125_s3, [#allocation3]  }
  0x93   :  { %74 = dma.done.wait [#allocation3], 256  }
  0x94   :  { %75 = vsyncadd [#allocation3], 4294967040 }
  0x95   :  { %48 = vsyncpa [#allocation3], 1 }

</bundles_post_ra>
